<compile_context>
chip_gen: v6e
topology: v6e:2x2x1
jax: 0.10.0
libtpu: 0.0.40
codegen_flags: <defaults>
</compile_context>

<pallas_src>
import functools

import jax
import jax.numpy as jnp
from jax.experimental import pallas as pl
from jax.experimental.pallas import tpu as pltpu


def _round_up(n, m):
    return ((n + m - 1) // m) * m


# ---------------------------------------------------------------------------
# Kernels
# ---------------------------------------------------------------------------
def _mlp_logits_kernel(x_ref, w1_ref, b1_ref, w2_ref, b2_ref, w3_ref, b3_ref,
                       out_ref):
    """Logits-only forward. Weights arrive lane-padded so the single output
    store is a full-width (multiple-of-128-lane) dense store."""
    h1 = jax.nn.sigmoid(
        jnp.dot(x_ref[...], w1_ref[...], preferred_element_type=jnp.float32)
        + b1_ref[...])
    h2 = jax.nn.sigmoid(
        jnp.dot(h1.astype(w2_ref.dtype), w2_ref[...],
                preferred_element_type=jnp.float32)
        + b2_ref[...])
    out_ref[...] = (
        jnp.dot(h2.astype(w3_ref.dtype), w3_ref[...],
                preferred_element_type=jnp.float32)
        + b3_ref[...])


def _mlp_full_kernel(x_ref, w1_ref, b1_ref, w2_ref, b2_ref, w3_ref, b3_ref,
                     slab_ref):
    """Forward that also returns intermediates. out|h1|h2 are written as three
    128-aligned, 128-multiple-wide stores into one fused lane-dense slab."""
    h1 = jax.nn.sigmoid(
        jnp.dot(x_ref[...], w1_ref[...], preferred_element_type=jnp.float32)
        + b1_ref[...])
    h2 = jax.nn.sigmoid(
        jnp.dot(h1.astype(w2_ref.dtype), w2_ref[...],
                preferred_element_type=jnp.float32)
        + b2_ref[...])
    out = (jnp.dot(h2.astype(w3_ref.dtype), w3_ref[...],
                   preferred_element_type=jnp.float32)
           + b3_ref[...])
    nop = w3_ref.shape[1]    # padded No
    nh1p = w1_ref.shape[1]   # padded Nh1
    slab_ref[:, :nop] = out
    slab_ref[:, nop:nop + nh1p] = h1
    slab_ref[:, nop + nh1p:] = h2


# ---------------------------------------------------------------------------
# Wrapper
# ---------------------------------------------------------------------------
@functools.partial(jax.jit,
                   static_argnames=("tile_b", "additional_out", "dot_dtype"))
def net_forward(x, params, *, tile_b=None, additional_out=False,
                dot_dtype=jnp.float32):
    """Pallas implementation of Net.forward: returns out, or (out, x1, x2)."""
    (w1, b1), (w2, b2), (w3, b3) = params
    B, Ni = x.shape
    Nh1 = w1.shape[1]
    Nh2 = w2.shape[1]
    No = w3.shape[1]

    # --- batch tile choice (large tile; >=2 grid steps when batch allows) ---
    if tile_b is None:
        if B >= 1024:
            tile_b = 512
        elif B >= 16:
            tile_b = _round_up((B + 1) // 2, 8)   # 2 grid steps -> both TCs (v7x)
        else:
            tile_b = _round_up(B, 8)
    tile_b = max(8, _round_up(int(tile_b), 8))

    Bp = _round_up(B, tile_b)          # pad ragged batch tail instead of assert
    num_tiles = Bp // tile_b

    xp = x.astype(jnp.float32)
    if Bp != B:
        xp = jnp.pad(xp, ((0, Bp - B), (0, 0)))

    # --- pad feature dims to 128-lane multiples (zero pads are inert) --------
    Nh1p = _round_up(Nh1, 128)
    Nh2p = _round_up(Nh2, 128)
    Nop = _round_up(No, 128)

    w1p = jnp.pad(w1.astype(jnp.float32), ((0, 0), (0, Nh1p - Nh1)))
    b1p = jnp.pad(b1.astype(jnp.float32), ((0, 0), (0, Nh1p - Nh1)))
    w2p = jnp.pad(w2.astype(jnp.float32), ((0, Nh1p - Nh1), (0, Nh2p - Nh2)))
    b2p = jnp.pad(b2.astype(jnp.float32), ((0, 0), (0, Nh2p - Nh2)))
    w3p = jnp.pad(w3.astype(jnp.float32), ((0, Nh2p - Nh2), (0, Nop - No)))
    b3p = jnp.pad(b3.astype(jnp.float32), ((0, 0), (0, Nop - No)))

    # optional bf16 storage for matmul operands (v6e/v7x); biases and all
    # elementwise/sigmoid math stay f32 (v5e has no bf16 VPU/EUP path).
    if dot_dtype != jnp.float32:
        xp = xp.astype(dot_dtype)
        w1p = w1p.astype(dot_dtype)
        w2p = w2p.astype(dot_dtype)
        w3p = w3p.astype(dot_dtype)

    # --- specs ---------------------------------------------------------------
    if num_tiles >= 4:
        # deepen prefetch on the streamed x input when the grid is long enough
        x_spec = pl.BlockSpec((tile_b, Ni), lambda i: (i, 0),
                              pipeline_mode=pl.Buffered(3))
    else:
        x_spec = pl.BlockSpec((tile_b, Ni), lambda i: (i, 0))

    # weights/biases: constant index_map keeps them resident in VMEM
    w_specs = [
        pl.BlockSpec((Ni, Nh1p), lambda i: (0, 0)),
        pl.BlockSpec((1, Nh1p), lambda i: (0, 0)),
        pl.BlockSpec((Nh1p, Nh2p), lambda i: (0, 0)),
        pl.BlockSpec((1, Nh2p), lambda i: (0, 0)),
        pl.BlockSpec((Nh2p, Nop), lambda i: (0, 0)),
        pl.BlockSpec((1, Nop), lambda i: (0, 0)),
    ]

    compiler_params = pltpu.CompilerParams(
        dimension_semantics=("parallel",),
        vmem_limit_bytes=32 * 1024 * 1024,   # explicit budget (safe on v5e/v6e/v7x)
    )

    if not additional_out:
        out_p = pl.pallas_call(
            _mlp_logits_kernel,
            out_shape=jax.ShapeDtypeStruct((Bp, Nop), jnp.float32),
            grid_spec=pltpu.PrefetchScalarGridSpec(
                num_scalar_prefetch=0,
                grid=(num_tiles,),
                in_specs=[x_spec] + w_specs,
                out_specs=pl.BlockSpec((tile_b, Nop), lambda i: (i, 0)),
            ),
            compiler_params=compiler_params,
        )(xp, w1p, b1p, w2p, b2p, w3p, b3p)
        return out_p[:B, :No]

    # additional_out=True: one fused lane-dense slab [out_p | h1_p | h2_p]
    W = Nop + Nh1p + Nh2p
    slab = pl.pallas_call(
        _mlp_full_kernel,
        out_shape=jax.ShapeDtypeStruct((Bp, W), jnp.float32),
        grid_spec=pltpu.PrefetchScalarGridSpec(
            num_scalar_prefetch=0,
            grid=(num_tiles,),
            in_specs=[x_spec] + w_specs,
            out_specs=pl.BlockSpec((tile_b, W), lambda i: (i, 0)),
        ),
        compiler_params=compiler_params,
    )(xp, w1p, b1p, w2p, b2p, w3p, b3p)

    out = slab[:B, :No]
    x1 = slab[:B, Nop:Nop + Nh1]
    x2 = slab[:B, Nop + Nh1p:Nop + Nh1p + Nh2]
    return out, x1, x2


# ---------------------------------------------------------------------------
# Params / reference
# ---------------------------------------------------------------------------
def init_params(key, Ni, Nh1, Nh2, No):
    """Deterministic init (PyTorch-Linear-style uniform fan-in bounds)."""
    ks = jax.random.split(key, 6)

    def linear(kw, kb, fan_in, fan_out):
        bound = 1.0 / jnp.sqrt(fan_in)
        # stored as [in, out] (transposed relative to PyTorch's [out, in])
        w = jax.random.uniform(kw, (fan_in, fan_out), jnp.float32, -bound, bound)
        b = jax.random.uniform(kb, (1, fan_out), jnp.float32, -bound, bound)
        return w, b

    return (
        linear(ks[0], ks[1], Ni, Nh1),
        linear(ks[2], ks[3], Nh1, Nh2),
        linear(ks[4], ks[5], Nh2, No),
    )


def net_forward_ref(x, params):
    (w1, b1), (w2, b2), (w3, b3) = params
    x1 = jax.nn.sigmoid(x @ w1 + b1)
    x2 = jax.nn.sigmoid(x1 @ w2 + b2)
    return x2 @ w3 + b3, x1, x2


# TODO(synk): Net.fit / Net.predict (training loop, optimizer, softmax argmax)
# are host-side utilities, not part of forward(); not implemented as kernels.

if __name__ == "__main__":
    Ni, Nh1, Nh2, No = 32, 64, 32, 8
    key = jax.random.PRNGKey(0)
    k_x, k_p = jax.random.split(key)
    params = init_params(k_p, Ni, Nh1, Nh2, No)

    # 1) tiny batch, additional_out path (returns out, x1, x2)
    B = 8
    x = jax.random.normal(k_x, (B, Ni), dtype=jnp.float32)
    out, x1, x2 = net_forward(x, params, additional_out=True)
    jax.block_until_ready((out, x1, x2))
    r_out, r_x1, r_x2 = net_forward_ref(x, params)
    assert out.shape == (B, No)
    assert jnp.allclose(out, r_out, atol=1e-4, rtol=1e-4)
    assert jnp.allclose(x1, r_x1, atol=1e-4, rtol=1e-4)
    assert jnp.allclose(x2, r_x2, atol=1e-4, rtol=1e-4)

    # 2) ragged batch (not a multiple of the tile), logits-only path
    B = 200
    x = jax.random.normal(jax.random.PRNGKey(1), (B, Ni), dtype=jnp.float32)
    out = net_forward(x, params)
    jax.block_until_ready(out)
    r_out, _, _ = net_forward_ref(x, params)
    assert out.shape == (B, No)
    assert jnp.allclose(out, r_out, atol=1e-4, rtol=1e-4)

    # 3) larger batch: multi-step grid with Buffered(3) x pipeline
    B = 2048
    x = jax.random.normal(jax.random.PRNGKey(2), (B, Ni), dtype=jnp.float32)
    out = net_forward(x, params)
    jax.block_until_ready(out)
    r_out, _, _ = net_forward_ref(x, params)
    assert jnp.allclose(out, r_out, atol=1e-4, rtol=1e-4)

    # 4) bf16 matmul-operand storage (v6e/v7x friendly), loose tolerance
    out_bf16 = net_forward(x, params, dot_dtype=jnp.bfloat16)
    jax.block_until_ready(out_bf16)
    assert jnp.allclose(out_bf16, r_out, atol=5e-2, rtol=5e-2)

    print("KERNEL_OK")
</pallas_src>

<mosaic_0001>
module attributes {stable_mosaic.version = 11 : i64} {
  func.func @_mlp_full_kernel(%arg0: i32, %arg1: memref<8x32xf32, #tpu.memory_space<vmem>>, %arg2: memref<32x128xf32, #tpu.memory_space<vmem>>, %arg3: memref<1x128xf32, #tpu.memory_space<vmem>>, %arg4: memref<128x128xf32, #tpu.memory_space<vmem>>, %arg5: memref<1x128xf32, #tpu.memory_space<vmem>>, %arg6: memref<128x128xf32, #tpu.memory_space<vmem>>, %arg7: memref<1x128xf32, #tpu.memory_space<vmem>>, %arg8: memref<8x384xf32, #tpu.memory_space<vmem>>) attributes {dimension_semantics = [#tpu.dimension_semantics<parallel>], iteration_bounds = array<i64: 1>, scalar_prefetch = 0 : i64, scratch_operands = 0 : i64, tpu.core_type = #tpu.core_type<tc>, window_params = [{transform_indices = @transform_0, window_bounds = array<i64: 8, 32>}, {pipeline_mode = #tpu.pipeline_mode<synchronous>, transform_indices = @transform_1, window_bounds = array<i64: 32, 128>}, {pipeline_mode = #tpu.pipeline_mode<synchronous>, transform_indices = @transform_2, window_bounds = array<i64: 1, 128>}, {pipeline_mode = #tpu.pipeline_mode<synchronous>, transform_indices = @transform_3, window_bounds = array<i64: 128, 128>}, {pipeline_mode = #tpu.pipeline_mode<synchronous>, transform_indices = @transform_4, window_bounds = array<i64: 1, 128>}, {pipeline_mode = #tpu.pipeline_mode<synchronous>, transform_indices = @transform_5, window_bounds = array<i64: 128, 128>}, {pipeline_mode = #tpu.pipeline_mode<synchronous>, transform_indices = @transform_6, window_bounds = array<i64: 1, 128>}, {transform_indices = @transform_7, window_bounds = array<i64: 8, 384>}]} {
    %c0 = arith.constant 0 : index
    %c0_0 = arith.constant 0 : index
    %0 = vector.load %arg1[%c0, %c0_0] : memref<8x32xf32, #tpu.memory_space<vmem>>, vector<8x32xf32>
    %c0_1 = arith.constant 0 : index
    %c0_2 = arith.constant 0 : index
    %1 = vector.load %arg2[%c0_1, %c0_2] : memref<32x128xf32, #tpu.memory_space<vmem>>, vector<32x128xf32>
    %cst = arith.constant dense<0.000000e+00> : vector<8x128xf32>
    %2 = tpu.matmul %0, %1, %cst {dimension_numbers = #tpu.dot_dimension_numbers<[1], [0], [0], [1], [0, 0, 1, 1], [], []>} : vector<8x32xf32>, vector<32x128xf32>, vector<8x128xf32> -> vector<8x128xf32>
    %c0_3 = arith.constant 0 : index
    %c0_4 = arith.constant 0 : index
    %3 = vector.load %arg3[%c0_3, %c0_4] : memref<1x128xf32, #tpu.memory_space<vmem>>, vector<1x128xf32>
    %4 = vector.broadcast %3 : vector<1x128xf32> to vector<8x128xf32>
    %5 = arith.addf %2, %4 : vector<8x128xf32>
    %6 = arith.negf %5 : vector<8x128xf32>
    %7 = math.exp %6 : vector<8x128xf32>
    %cst_5 = arith.constant 1.000000e+00 : f32
    %8 = vector.broadcast %cst_5 : f32 to vector<8x128xf32>
    %9 = arith.addf %8, %7 : vector<8x128xf32>
    %10 = arith.divf %8, %9 : vector<8x128xf32>
    %c0_6 = arith.constant 0 : index
    %c0_7 = arith.constant 0 : index
    %11 = vector.load %arg4[%c0_6, %c0_7] : memref<128x128xf32, #tpu.memory_space<vmem>>, vector<128x128xf32>
    %cst_8 = arith.constant dense<0.000000e+00> : vector<8x128xf32>
    %12 = tpu.matmul %10, %11, %cst_8 {dimension_numbers = #tpu.dot_dimension_numbers<[1], [0], [0], [1], [0, 0, 1, 1], [], []>} : vector<8x128xf32>, vector<128x128xf32>, vector<8x128xf32> -> vector<8x128xf32>
    %c0_9 = arith.constant 0 : index
    %c0_10 = arith.constant 0 : index
    %13 = vector.load %arg5[%c0_9, %c0_10] : memref<1x128xf32, #tpu.memory_space<vmem>>, vector<1x128xf32>
    %14 = vector.broadcast %13 : vector<1x128xf32> to vector<8x128xf32>
    %15 = arith.addf %12, %14 : vector<8x128xf32>
    %16 = arith.negf %15 : vector<8x128xf32>
    %17 = math.exp %16 : vector<8x128xf32>
    %cst_11 = arith.constant 1.000000e+00 : f32
    %18 = vector.broadcast %cst_11 : f32 to vector<8x128xf32>
    %19 = arith.addf %18, %17 : vector<8x128xf32>
    %20 = arith.divf %18, %19 : vector<8x128xf32>
    %c0_12 = arith.constant 0 : index
    %c0_13 = arith.constant 0 : index
    %21 = vector.load %arg6[%c0_12, %c0_13] : memref<128x128xf32, #tpu.memory_space<vmem>>, vector<128x128xf32>
    %cst_14 = arith.constant dense<0.000000e+00> : vector<8x128xf32>
    %22 = tpu.matmul %20, %21, %cst_14 {dimension_numbers = #tpu.dot_dimension_numbers<[1], [0], [0], [1], [0, 0, 1, 1], [], []>} : vector<8x128xf32>, vector<128x128xf32>, vector<8x128xf32> -> vector<8x128xf32>
    %c0_15 = arith.constant 0 : index
    %c0_16 = arith.constant 0 : index
    %23 = vector.load %arg7[%c0_15, %c0_16] : memref<1x128xf32, #tpu.memory_space<vmem>>, vector<1x128xf32>
    %24 = vector.broadcast %23 : vector<1x128xf32> to vector<8x128xf32>
    %25 = arith.addf %22, %24 : vector<8x128xf32>
    %c0_17 = arith.constant 0 : index
    %c0_18 = arith.constant 0 : index
    %26 = vector.load %arg8[%c0_17, %c0_18] : memref<8x384xf32, #tpu.memory_space<vmem>>, vector<8x128xf32>
    tpu.vector_store %arg8[%c0_17, %c0_18], %25 {strides = array<i32>} : memref<8x384xf32, #tpu.memory_space<vmem>>, vector<8x128xf32>,
    %c0_19 = arith.constant 0 : index
    %c128 = arith.constant 128 : index
    %27 = vector.load %arg8[%c0_19, %c128] : memref<8x384xf32, #tpu.memory_space<vmem>>, vector<8x128xf32>
    tpu.vector_store %arg8[%c0_19, %c128], %10 {strides = array<i32>} : memref<8x384xf32, #tpu.memory_space<vmem>>, vector<8x128xf32>,
    %c0_20 = arith.constant 0 : index
    %c256 = arith.constant 256 : index
    %28 = vector.load %arg8[%c0_20, %c256] : memref<8x384xf32, #tpu.memory_space<vmem>>, vector<8x128xf32>
    tpu.vector_store %arg8[%c0_20, %c256], %20 {strides = array<i32>} : memref<8x384xf32, #tpu.memory_space<vmem>>, vector<8x128xf32>,
    return
  }
  func.func @transform_0(%arg0: i32) -> (i32, i32) {
    %c0_i32 = arith.constant 0 : i32
    %c0_i32_0 = arith.constant 0 : i32
    return %arg0, %c0_i32 : i32, i32
  }
  func.func @transform_1(%arg0: i32) -> (i32, i32) {
    %c0_i32 = arith.constant 0 : i32
    %c0_i32_0 = arith.constant 0 : i32
    %c0_i32_1 = arith.constant 0 : i32
    return %c0_i32, %c0_i32_0 : i32, i32
  }
  func.func @transform_2(%arg0: i32) -> (i32, i32) {
    %c0_i32 = arith.constant 0 : i32
    %c0_i32_0 = arith.constant 0 : i32
    %c0_i32_1 = arith.constant 0 : i32
    return %c0_i32, %c0_i32_0 : i32, i32
  }
  func.func @transform_3(%arg0: i32) -> (i32, i32) {
    %c0_i32 = arith.constant 0 : i32
    %c0_i32_0 = arith.constant 0 : i32
    %c0_i32_1 = arith.constant 0 : i32
    return %c0_i32, %c0_i32_0 : i32, i32
  }
  func.func @transform_4(%arg0: i32) -> (i32, i32) {
    %c0_i32 = arith.constant 0 : i32
    %c0_i32_0 = arith.constant 0 : i32
    %c0_i32_1 = arith.constant 0 : i32
    return %c0_i32, %c0_i32_0 : i32, i32
  }
  func.func @transform_5(%arg0: i32) -> (i32, i32) {
    %c0_i32 = arith.constant 0 : i32
    %c0_i32_0 = arith.constant 0 : i32
    %c0_i32_1 = arith.constant 0 : i32
    return %c0_i32, %c0_i32_0 : i32, i32
  }
  func.func @transform_6(%arg0: i32) -> (i32, i32) {
    %c0_i32 = arith.constant 0 : i32
    %c0_i32_0 = arith.constant 0 : i32
    %c0_i32_1 = arith.constant 0 : i32
    return %c0_i32, %c0_i32_0 : i32, i32
  }
  func.func @transform_7(%arg0: i32) -> (i32, i32) {
    %c0_i32 = arith.constant 0 : i32
    %c0_i32_0 = arith.constant 0 : i32
    return %arg0, %c0_i32 : i32, i32
  }
}

</mosaic_0001>

<bundles_post_ra>
// kernel: net_forward.1
= control target key start
LH: loop header
LB: loop body
LE: loop exit
PB: predicated region body
PF: predicated region fallthrough
CT: control target
= control target key end

     0   :  { %v453_v0 = vmov 0.0   ;;  %vm454_vm0 = vmmov 0   ;;  %vm38_vm1 = vcmask 261120   ;;  %s666_s1 = inlined_call_operand.vmem [shape: f32[32,128], index: 1, kind: input, shape index: {}]   ;;  %s667_s0 = inlined_call_operand.vmem [shape: f32[8,32], index: 0, kind: input, shape index: {}]   ;;  %s668_s3 = inlined_call_operand.vmem [shape: f32[128,128], index: 3, kind: input, shape index: {}]   ;;  %s669_s2 = inlined_call_operand.vmem [shape: f32[1,128], index: 2, kind: input, shape index: {}]   ;;  %s670_s7 = inlined_call_operand.vmem [shape: f32[8,384], index: 7, kind: output, shape index: {}]   ;;  %s671_s5 = inlined_call_operand.vmem [shape: f32[128,128], index: 5, kind: input, shape index: {}]   ;;  %s672_s4 = inlined_call_operand.vmem [shape: f32[1,128], index: 4, kind: input, shape index: {}]   ;;  %s673_s6 = inlined_call_operand.vmem [shape: f32[1,128], index: 6, kind: input, shape index: {}]  }
   0x1   :  { %362 = vmatprep.subr.mxu0 %v453_v0  ;;  %v30_v1 = vld [vmem:[%s666_s1 + $0x18] sm:$0xff]  ;;  %v29_v2 = vld [vmem:[%s666_s1 + $0x10] sm:$0xff]  ;;  %370 = vmatprep.mubr.msk.f32.mxu0 %vm454_vm0, %v453_v0  ;;  %v28_v3 = vld [vmem:[%s666_s1 + $0x8] sm:$0xff] }
   0x2   :  { %363 = vmatpush3.msra.mxu0 %v30_v1  ;;  %373 = vmatprep.subr.mxu1 %v453_v0  ;;  %v27_v4 = vld [vmem:[%s666_s1] sm:$0xff]  ;;  %v133_v6 = vld [vmem:[%s668_s3 + $0x78] sm:$0xff]  ;;  %v132_v7 = vld [vmem:[%s668_s3 + $0x70] sm:$0xff] }
   0x3   :  { %364 = vmatprep.subr.mxu0 %v453_v0  ;;  %405 = vmatprep.mubr.msk.f32.mxu1 %vm454_vm0, %v453_v0  ;;  %v26_v5 = vld [vmem:[%s667_s0] sm:$0xff]  ;;  %v131_v8 = vld [vmem:[%s668_s3 + $0x68] sm:$0xff]  ;;  %v129_v10 = vld [vmem:[%s668_s3 + $0x58] sm:$0xff] }
   0x4   :  { %365 = vmatpush3.msra.mxu0 %v29_v2  ;;  %374 = vmatpush3.msra.mxu1 %v133_v6  ;;  %v130_v9 = vld [vmem:[%s668_s3 + $0x60] sm:$0xff]  ;;  %v128_v11 = vld [vmem:[%s668_s3 + $0x50] sm:$0xff]  ;;  %v127_v12 = vld [vmem:[%s668_s3 + $0x48] sm:$0xff] }
   0x5   :  { %366 = vmatprep.subr.mxu0 %v453_v0  ;;  %375 = vmatprep.subr.mxu1 %v453_v0  ;;  %v126_v13 = vld [vmem:[%s668_s3 + $0x40] sm:$0xff]  ;;  %v125_v14 = vld [vmem:[%s668_s3 + $0x38] sm:$0xff]  ;;  %v124_v15 = vld [vmem:[%s668_s3 + $0x30] sm:$0xff] }
   0x6   :  { %367 = vmatpush3.msra.mxu0 %v28_v3  ;;  %376 = vmatpush3.msra.mxu1 %v132_v7  ;;  %v123_v16 = vld [vmem:[%s668_s3 + $0x28] sm:$0xff]  ;;  %v122_v17 = vld [vmem:[%s668_s3 + $0x20] sm:$0xff]  ;;  %v121_v18 = vld [vmem:[%s668_s3 + $0x18] sm:$0xff] }
   0x7   :  { %368 = vmatprep.subr.mxu0 %v453_v0  ;;  %377 = vmatprep.subr.mxu1 %v453_v0  ;;  %v120_v19 = vld [vmem:[%s668_s3 + $0x10] sm:$0xff]  ;;  %v119_v20 = vld [vmem:[%s668_s3 + $0x8] sm:$0xff]  ;;  %v118_v21 = vld [vmem:[%s668_s3] sm:$0xff] }
   0x8   :  { %369 = vmatpush3.msra.mxu0 %v27_v4  ;;  %378 = vmatpush3.msra.mxu1 %v131_v8  ;;  %v317_v22 = vld [vmem:[%s669_s2] ss:$0 sm:$0xff]  ;;  %v232_v30 = vld [vmem:[%s671_s5 + $0x78] sm:$0xff]  ;;  %v231_v31 = vld [vmem:[%s671_s5 + $0x70] sm:$0xff] }
   0x9   :  { %371 = vmatmul.mubr.msk.f32.vlgmr.msra.gmra.mxu0 %vm38_vm1, %v26_v5  ;;  %408 = vmatprep.subr.mxu0 %v453_v0  ;;  %v230_v32 = vld [vmem:[%s671_s5 + $0x68] sm:$0xff]  ;;  %v229_v33 = vld [vmem:[%s671_s5 + $0x60] sm:$0xff]  ;;  %v228_v34 = vld [vmem:[%s671_s5 + $0x58] sm:$0xff] }
   0xa   :  { %440 = vmatprep.mubr.msk.f32.mxu0 %vm454_vm0, %v453_v0  ;;  %379 = vmatprep.subr.mxu1 %v453_v0  ;;  %v227_v35 = vld [vmem:[%s671_s5 + $0x50] sm:$0xff]  ;;  %v226_v36 = vld [vmem:[%s671_s5 + $0x48] sm:$0xff]  ;;  %v225_v37 = vld [vmem:[%s671_s5 + $0x40] sm:$0xff] }
   0xb   :  { %380 = vmatpush3.msra.mxu1 %v130_v9  ;;  %409 = vmatpush3.msra.mxu0 %v232_v30  ;;  %v224_v38 = vld [vmem:[%s671_s5 + $0x38] sm:$0xff]  ;;  %v223_v39 = vld [vmem:[%s671_s5 + $0x30] sm:$0xff]  ;;  %v222_v40 = vld [vmem:[%s671_s5 + $0x28] sm:$0xff] }
   0xc   :  { %381 = vmatprep.subr.mxu1 %v453_v0  ;;  %410 = vmatprep.subr.mxu0 %v453_v0  ;;  %v221_v41 = vld [vmem:[%s671_s5 + $0x20] sm:$0xff]  ;;  %v220_v42 = vld [vmem:[%s671_s5 + $0x18] sm:$0xff]  ;;  %v219_v43 = vld [vmem:[%s671_s5 + $0x10] sm:$0xff] }
   0xd   :  { %382 = vmatpush3.msra.mxu1 %v129_v10  ;;  %411 = vmatpush3.msra.mxu0 %v231_v31  ;;  %v218_v44 = vld [vmem:[%s671_s5 + $0x8] sm:$0xff]  ;;  %v217_v45 = vld [vmem:[%s671_s5] sm:$0xff] }
   0xe   :  { %383 = vmatprep.subr.mxu1 %v453_v0  ;;  %412 = vmatprep.subr.mxu0 %v453_v0  ;;  %v320_v46 = vld [vmem:[%s672_s4] ss:$0 sm:$0xff] }
   0xf   :  { %384 = vmatpush3.msra.mxu1 %v128_v11  ;;  %413 = vmatpush3.msra.mxu0 %v230_v32  ;;  %v322_v54 = vld [vmem:[%s673_s6] ss:$0 sm:$0xff] }
  0x10   :  { %385 = vmatprep.subr.mxu1 %v453_v0  ;;  %414 = vmatprep.subr.mxu0 %v453_v0 }
  0x11   :  { %386 = vmatpush3.msra.mxu1 %v127_v12  ;;  %415 = vmatpush3.msra.mxu0 %v229_v33 }
  0x12   :  { %387 = vmatprep.subr.mxu1 %v453_v0  ;;  %416 = vmatprep.subr.mxu0 %v453_v0 }
  0x13   :  { %388 = vmatpush3.msra.mxu1 %v126_v13  ;;  %417 = vmatpush3.msra.mxu0 %v228_v34 }
  0x14   :  { %389 = vmatprep.subr.mxu1 %v453_v0  ;;  %418 = vmatprep.subr.mxu0 %v453_v0 }
  0x15   :  { %390 = vmatpush3.msra.mxu1 %v125_v14  ;;  %419 = vmatpush3.msra.mxu0 %v227_v35 }
  0x16   :  { %391 = vmatprep.subr.mxu1 %v453_v0  ;;  %420 = vmatprep.subr.mxu0 %v453_v0 }
  0x17   :  { %392 = vmatpush3.msra.mxu1 %v124_v15  ;;  %421 = vmatpush3.msra.mxu0 %v226_v36 }
  0x18   :  { %393 = vmatprep.subr.mxu1 %v453_v0  ;;  %422 = vmatprep.subr.mxu0 %v453_v0 }
  0x19   :  { %394 = vmatpush3.msra.mxu1 %v123_v16  ;;  %423 = vmatpush3.msra.mxu0 %v225_v37 }
  0x1a   :  { %395 = vmatprep.subr.mxu1 %v453_v0  ;;  %424 = vmatprep.subr.mxu0 %v453_v0 }
  0x1b   :  { %396 = vmatpush3.msra.mxu1 %v122_v17  ;;  %425 = vmatpush3.msra.mxu0 %v224_v38 }
  0x1c   :  { %397 = vmatprep.subr.mxu1 %v453_v0  ;;  %426 = vmatprep.subr.mxu0 %v453_v0 }
  0x1d   :  { %398 = vmatpush3.msra.mxu1 %v121_v18  ;;  %427 = vmatpush3.msra.mxu0 %v223_v39 }
  0x1e   :  { %399 = vmatprep.subr.mxu1 %v453_v0  ;;  %428 = vmatprep.subr.mxu0 %v453_v0 }
  0x1f   :  { %400 = vmatpush3.msra.mxu1 %v120_v19  ;;  %429 = vmatpush3.msra.mxu0 %v222_v40 }
  0x20   :  { %401 = vmatprep.subr.mxu1 %v453_v0  ;;  %430 = vmatprep.subr.mxu0 %v453_v0 }
  0x21   :  { %402 = vmatpush3.msra.mxu1 %v119_v20  ;;  %431 = vmatpush3.msra.mxu0 %v221_v41 }
  0x22   :  { %403 = vmatprep.subr.mxu1 %v453_v0  ;;  %432 = vmatprep.subr.mxu0 %v453_v0 }
  0x23   :  { %404 = vmatpush3.msra.mxu1 %v118_v21  ;;  %433 = vmatpush3.msra.mxu0 %v220_v42 }
  0x24   :  { %434 = vmatprep.subr.mxu0 %v453_v0 }
  0x25   :  { %435 = vmatpush3.msra.mxu0 %v219_v43 }
  0x26   :  { %436 = vmatprep.subr.mxu0 %v453_v0 }
  0x27   :  { %437 = vmatpush3.msra.mxu0 %v218_v44 }
  0x28   :  { %438 = vmatprep.subr.mxu0 %v453_v0 }
  0x29   :  { %439 = vmatpush3.msra.mxu0 %v217_v45 }
  0xc9   :  { %v108_v23 = vpop.f32.mrf.mxu0 }
  0xca   :  { %v109_v24 = vadd.f32 %v317_v22, %v108_v23 }
  0xcb   :  { %v372_v25 = vpop.f32.mrf.mxu0 }
  0xcc   :  { %v319_v26 = vmul.f32 -1.442695, %v109_v24 }
  0xce   :  { %445 = vpow2.f32 %v319_v26 }
  0xdb   :  { %v446_v27 = vpop.eup %445 }
  0xdc   :  { %v115_v28 = vadd.f32 1.0, %v446_v27 }
  0xde   :  { %447 = vrcp.f32 %v115_v28 }
  0xeb   :  { %v448_v29 = vpop.eup %447 }
  0xec   :  { %406 = vmatmul.mubr.f32.vlgmr.msra.gmra.mxu1 %v448_v29  ;;  %311 = vst [vmem:[%s670_s7 + $0x8] sm:$0xff] %v448_v29 }
 0x1ac   :  { %v207_v47 = vpop.f32.mrf.mxu1 }
 0x1ad   :  { %v208_v48 = vadd.f32 %v320_v46, %v207_v47 }
 0x1ae   :  { %v407_v49 = vpop.f32.mrf.mxu1 }
 0x1af   :  { %v321_v50 = vmul.f32 -1.442695, %v208_v48 }
 0x1b1   :  { %449 = vpow2.f32 %v321_v50 }
 0x1be   :  { %v450_v51 = vpop.eup %449 }
 0x1bf   :  { %v214_v52 = vadd.f32 1.0, %v450_v51 }
 0x1c1   :  { %451 = vrcp.f32 %v214_v52 }
 0x1ce   :  { %v452_v53 = vpop.eup %451 }
 0x1cf   :  { %441 = vmatmul.mubr.f32.vlgmr.msra.gmra.mxu0 %v452_v53  ;;  %312 = vst [vmem:[%s670_s7 + $0x10] sm:$0xff] %v452_v53 }
 0x28f   :  { %v306_v55 = vpop.f32.mrf.mxu0 }
 0x290   :  { %v307_v56 = vadd.f32 %v322_v54, %v306_v55 }
 0x291   :  { %v442_v57 = vpop.f32.mrf.mxu0 }
 0x292   :  { %310 = vst [vmem:[%s670_s7] sm:$0xff] %v307_v56 }

</bundles_post_ra>
